<compile_context>
chip_gen: v7x
topology: tpu7x:2x2x1
jax: 0.10.0
libtpu: 0.0.40
codegen_flags: <defaults>
</compile_context>

<pallas_src>
import functools

import jax
import jax.numpy as jnp
from jax import lax
from jax.experimental import pallas as pl
from jax.experimental.pallas import tpu as pltpu


def _basic_block_kernel(x_ref, w1_ref, w2_ref, mask_ref,
                        s1_ref, b1_ref, s2_ref, b2_ref, out_ref,
                        *, W, HW, Cin, Cout):
    """One batch element per grid step.

    x_ref:    (1, Cin, HW)   f32, NCHW-flat input (HW = H*W on the lane axis)
    w1_ref:   (9, Cout, Cin) bf16, conv1 taps, t = kh*3 + kw
    w2_ref:   (9, Cout, Cout)bf16, conv2 taps
    mask_ref: (9, 1, HW)     f32, per-tap validity mask (implicit zero pad)
    s*/b*:    (Cout, 1)      f32, folded BN scale / shift
    out_ref:  (1, Cout, HW)  f32
    """
    x_f32 = x_ref[0]                                        # (Cin, HW) f32

    # Tap order t = (dh+1)*3 + (dw+1) matches the (kh, kw) weight layout.
    offs = tuple(dh * W + dw for dh in (-1, 0, 1) for dw in (-1, 0, 1))
    masks = [mask_ref[t] for t in range(9)]                 # each (1, HW) f32

    def conv3x3(inp_f32, w_ref):
        acc = jnp.zeros((Cout, HW), jnp.float32)
        for t, off in enumerate(offs):
            if off == 0:
                shifted = inp_f32
            else:
                # shifted[c, p] = inp[c, (p + off) % HW]; out-of-image lanes
                # are zeroed by the mask (== zero padding of the conv).
                shifted = pltpu.roll(inp_f32, shift=(-off) % HW, axis=1)
            patch = (shifted * masks[t]).astype(jnp.bfloat16)      # (*, HW)
            acc = acc + jnp.dot(w_ref[t], patch,
                                preferred_element_type=jnp.float32)
        return acc

    # conv1 -> bn1 -> relu   (BN/ReLU in f32)
    out1 = jnp.maximum(conv3x3(x_f32, w1_ref) * s1_ref[...] + b1_ref[...], 0.0)
    # conv2 -> bn2 -> + identity -> relu  (identity = original f32 input)
    out2 = jnp.maximum(conv3x3(out1, w2_ref) * s2_ref[...] + b2_ref[...] + x_f32,
                       0.0)
    out_ref[0] = out2.astype(out_ref.dtype)


def basic_block_pallas(x_nchw, w1, w2, bn1, bn2, eps=1e-5):
    """x_nchw: (N, C, H, W) f32.  w1/w2: (Cout, Cin, 3, 3) OIHW (PyTorch).
    bn1/bn2: dicts with gamma, beta, mean, var of shape (Cout,)."""
    N, Cin, H, W = x_nchw.shape
    Cout = w1.shape[0]
    assert Cin == Cout, "identity skip requires inplanes == planes (no downsample)"
    assert w1.shape == (Cout, Cin, 3, 3) and w2.shape == (Cout, Cout, 3, 3)
    HW = H * W

    # Fold BN (inference mode) into per-channel scale/shift, shaped (Cout, 1)
    # so they broadcast over the (Cout, HW) activation layout.
    def fold(bn):
        scale = bn['gamma'] / jnp.sqrt(bn['var'] + eps)
        shift = bn['beta'] - bn['mean'] * scale
        return (scale.reshape(Cout, 1).astype(jnp.float32),
                shift.reshape(Cout, 1).astype(jnp.float32))

    s1, b1 = fold(bn1)
    s2, b2 = fold(bn2)

    # NCHW -> (N, C, H*W): free reshape, no pad, no transpose.
    x_flat = x_nchw.reshape(N, Cin, HW).astype(jnp.float32)

    # OIHW -> (9 taps, Cout, Cin), bf16 for the MXU.
    w1_k = jnp.transpose(w1, (2, 3, 0, 1)).reshape(9, Cout, Cin).astype(jnp.bfloat16)
    w2_k = jnp.transpose(w2, (2, 3, 0, 1)).reshape(9, Cout, Cout).astype(jnp.bfloat16)

    # Per-tap validity masks: 1 where the 3x3 window stays inside the image,
    # 0 where it would read the (implicit) zero padding.
    hh = jnp.arange(H).reshape(H, 1)
    ww = jnp.arange(W).reshape(1, W)
    masks = []
    for dh in (-1, 0, 1):
        for dw in (-1, 0, 1):
            valid = ((hh + dh >= 0) & (hh + dh < H) &
                     (ww + dw >= 0) & (ww + dw < W))
            masks.append(valid.reshape(1, HW))
    mask_arr = jnp.stack(masks, axis=0).astype(jnp.float32)        # (9, 1, HW)

    kernel = functools.partial(_basic_block_kernel,
                               W=W, HW=HW, Cin=Cin, Cout=Cout)

    out_flat = pl.pallas_call(
        kernel,
        out_shape=jax.ShapeDtypeStruct((N, Cout, HW), jnp.float32),
        grid=(N,),
        in_specs=[
            pl.BlockSpec((1, Cin, HW), lambda n: (n, 0, 0)),
            pl.BlockSpec((9, Cout, Cin), lambda n: (0, 0, 0)),
            pl.BlockSpec((9, Cout, Cout), lambda n: (0, 0, 0)),
            pl.BlockSpec((9, 1, HW), lambda n: (0, 0, 0)),
            pl.BlockSpec((Cout, 1), lambda n: (0, 0)),
            pl.BlockSpec((Cout, 1), lambda n: (0, 0)),
            pl.BlockSpec((Cout, 1), lambda n: (0, 0)),
            pl.BlockSpec((Cout, 1), lambda n: (0, 0)),
        ],
        out_specs=pl.BlockSpec((1, Cout, HW), lambda n: (n, 0, 0)),
        compiler_params=pltpu.CompilerParams(
            dimension_semantics=("parallel",),
            vmem_limit_bytes=32 * 1024 * 1024),
    )(x_flat, w1_k, w2_k, mask_arr, s1, b1, s2, b2)

    # (N, Cout, H*W) -> NCHW: free reshape.
    return out_flat.reshape(N, Cout, H, W)


def basic_block_ref(x, w1, w2, bn1, bn2, eps=1e-5):
    """Pure-JAX f32 NCHW reference for correctness checking."""
    def conv(y, w):
        return lax.conv_general_dilated(
            y, w, window_strides=(1, 1), padding=((1, 1), (1, 1)),
            dimension_numbers=('NCHW', 'OIHW', 'NCHW'),
            precision=lax.Precision.HIGHEST)

    def bn(y, p):
        scale = p['gamma'] / jnp.sqrt(p['var'] + eps)
        shift = p['beta'] - p['mean'] * scale
        return y * scale[None, :, None, None] + shift[None, :, None, None]

    identity = x
    out = jnp.maximum(bn(conv(x, w1), bn1), 0.0)
    out = bn(conv(out, w2), bn2)
    return jnp.maximum(out + identity, 0.0)


if __name__ == "__main__":
    key = jax.random.PRNGKey(0)
    N, C, H, W = 2, 4, 16, 16  # inplanes = planes = 4, stride = 1, no downsample

    k = jax.random.split(key, 11)
    x = jax.random.normal(k[0], (N, C, H, W), jnp.float32)
    w1 = jax.random.normal(k[1], (C, C, 3, 3), jnp.float32) * 0.2
    w2 = jax.random.normal(k[2], (C, C, 3, 3), jnp.float32) * 0.2
    bn1 = dict(gamma=jax.random.uniform(k[3], (C,), minval=0.5, maxval=1.5),
               beta=jax.random.normal(k[4], (C,)) * 0.1,
               mean=jax.random.normal(k[5], (C,)) * 0.1,
               var=jax.random.uniform(k[6], (C,), minval=0.5, maxval=1.5))
    bn2 = dict(gamma=jax.random.uniform(k[7], (C,), minval=0.5, maxval=1.5),
               beta=jax.random.normal(k[8], (C,)) * 0.1,
               mean=jax.random.normal(k[9], (C,)) * 0.1,
               var=jax.random.uniform(k[10], (C,), minval=0.5, maxval=1.5))

    out = jax.block_until_ready(basic_block_pallas(x, w1, w2, bn1, bn2))
    ref = jax.block_until_ready(basic_block_ref(x, w1, w2, bn1, bn2))

    assert out.shape == (N, C, H, W)
    # The kernel feeds bf16 operands to the MXU (f32 accumulation), so compare
    # against the f32 reference with a bf16-appropriate tolerance.
    assert jnp.allclose(out, ref, atol=1e-1, rtol=1e-1), \
        float(jnp.max(jnp.abs(out - ref)))
    print("KERNEL_OK")
</pallas_src>

<mosaic_0001>
module attributes {stable_mosaic.version = 11 : i64} {
  func.func @_basic_block_kernel(%arg0: i32, %arg1: memref<1x4x256xf32, #tpu.memory_space<vmem>>, %arg2: memref<9x4x4xbf16, #tpu.memory_space<vmem>>, %arg3: memref<9x4x4xbf16, #tpu.memory_space<vmem>>, %arg4: memref<9x1x256xf32, #tpu.memory_space<vmem>>, %arg5: memref<4x1xf32, #tpu.memory_space<vmem>>, %arg6: memref<4x1xf32, #tpu.memory_space<vmem>>, %arg7: memref<4x1xf32, #tpu.memory_space<vmem>>, %arg8: memref<4x1xf32, #tpu.memory_space<vmem>>, %arg9: memref<1x4x256xf32, #tpu.memory_space<vmem>>) attributes {dimension_semantics = [#tpu.dimension_semantics<parallel>], iteration_bounds = array<i64: 2>, scalar_prefetch = 0 : i64, scratch_operands = 0 : i64, tpu.core_type = #tpu.core_type<tc>, window_params = [{transform_indices = @transform_0, window_bounds = array<i64: 1, 4, 256>}, {pipeline_mode = #tpu.pipeline_mode<synchronous>, transform_indices = @transform_1, window_bounds = array<i64: 9, 4, 4>}, {pipeline_mode = #tpu.pipeline_mode<synchronous>, transform_indices = @transform_2, window_bounds = array<i64: 9, 4, 4>}, {pipeline_mode = #tpu.pipeline_mode<synchronous>, transform_indices = @transform_3, window_bounds = array<i64: 9, 1, 256>}, {pipeline_mode = #tpu.pipeline_mode<synchronous>, transform_indices = @transform_4, window_bounds = array<i64: 4, 1>}, {pipeline_mode = #tpu.pipeline_mode<synchronous>, transform_indices = @transform_5, window_bounds = array<i64: 4, 1>}, {pipeline_mode = #tpu.pipeline_mode<synchronous>, transform_indices = @transform_6, window_bounds = array<i64: 4, 1>}, {pipeline_mode = #tpu.pipeline_mode<synchronous>, transform_indices = @transform_7, window_bounds = array<i64: 4, 1>}, {transform_indices = @transform_8, window_bounds = array<i64: 1, 4, 256>}]} {
    %c0 = arith.constant 0 : index
    %c0_0 = arith.constant 0 : index
    %c0_1 = arith.constant 0 : index
    %0 = vector.load %arg1[%c0, %c0_0, %c0_1] : memref<1x4x256xf32, #tpu.memory_space<vmem>>, vector<1x4x256xf32>
    %1 = vector.shape_cast %0 : vector<1x4x256xf32> to vector<4x256xf32>
    %c0_2 = arith.constant 0 : index
    %c0_3 = arith.constant 0 : index
    %c0_4 = arith.constant 0 : index
    %2 = vector.load %arg4[%c0_2, %c0_3, %c0_4] : memref<9x1x256xf32, #tpu.memory_space<vmem>>, vector<1x1x256xf32>
    %3 = vector.shape_cast %2 : vector<1x1x256xf32> to vector<1x256xf32>
    %c1 = arith.constant 1 : index
    %c0_5 = arith.constant 0 : index
    %c0_6 = arith.constant 0 : index
    %4 = vector.load %arg4[%c1, %c0_5, %c0_6] : memref<9x1x256xf32, #tpu.memory_space<vmem>>, vector<1x1x256xf32>
    %5 = vector.shape_cast %4 : vector<1x1x256xf32> to vector<1x256xf32>
    %c2 = arith.constant 2 : index
    %c0_7 = arith.constant 0 : index
    %c0_8 = arith.constant 0 : index
    %6 = vector.load %arg4[%c2, %c0_7, %c0_8] : memref<9x1x256xf32, #tpu.memory_space<vmem>>, vector<1x1x256xf32>
    %7 = vector.shape_cast %6 : vector<1x1x256xf32> to vector<1x256xf32>
    %c3 = arith.constant 3 : index
    %c0_9 = arith.constant 0 : index
    %c0_10 = arith.constant 0 : index
    %8 = vector.load %arg4[%c3, %c0_9, %c0_10] : memref<9x1x256xf32, #tpu.memory_space<vmem>>, vector<1x1x256xf32>
    %9 = vector.shape_cast %8 : vector<1x1x256xf32> to vector<1x256xf32>
    %c4 = arith.constant 4 : index
    %c0_11 = arith.constant 0 : index
    %c0_12 = arith.constant 0 : index
    %10 = vector.load %arg4[%c4, %c0_11, %c0_12] : memref<9x1x256xf32, #tpu.memory_space<vmem>>, vector<1x1x256xf32>
    %11 = vector.shape_cast %10 : vector<1x1x256xf32> to vector<1x256xf32>
    %c5 = arith.constant 5 : index
    %c0_13 = arith.constant 0 : index
    %c0_14 = arith.constant 0 : index
    %12 = vector.load %arg4[%c5, %c0_13, %c0_14] : memref<9x1x256xf32, #tpu.memory_space<vmem>>, vector<1x1x256xf32>
    %13 = vector.shape_cast %12 : vector<1x1x256xf32> to vector<1x256xf32>
    %c6 = arith.constant 6 : index
    %c0_15 = arith.constant 0 : index
    %c0_16 = arith.constant 0 : index
    %14 = vector.load %arg4[%c6, %c0_15, %c0_16] : memref<9x1x256xf32, #tpu.memory_space<vmem>>, vector<1x1x256xf32>
    %15 = vector.shape_cast %14 : vector<1x1x256xf32> to vector<1x256xf32>
    %c7 = arith.constant 7 : index
    %c0_17 = arith.constant 0 : index
    %c0_18 = arith.constant 0 : index
    %16 = vector.load %arg4[%c7, %c0_17, %c0_18] : memref<9x1x256xf32, #tpu.memory_space<vmem>>, vector<1x1x256xf32>
    %17 = vector.shape_cast %16 : vector<1x1x256xf32> to vector<1x256xf32>
    %c8 = arith.constant 8 : index
    %c0_19 = arith.constant 0 : index
    %c0_20 = arith.constant 0 : index
    %18 = vector.load %arg4[%c8, %c0_19, %c0_20] : memref<9x1x256xf32, #tpu.memory_space<vmem>>, vector<1x1x256xf32>
    %19 = vector.shape_cast %18 : vector<1x1x256xf32> to vector<1x256xf32>
    %cst = arith.constant 0.000000e+00 : f32
    %20 = vector.broadcast %cst : f32 to vector<4x256xf32>
    %c17_i32 = arith.constant 17 : i32
    %21 = tpu.dynamic_rotate %1 by %c17_i32 dim 1 : vector<4x256xf32>, i32 -> vector<4x256xf32>
    %22 = vector.broadcast %3 : vector<1x256xf32> to vector<4x256xf32>
    %23 = arith.mulf %21, %22 : vector<4x256xf32>
    %24 = arith.truncf %23 : vector<4x256xf32> to vector<4x256xbf16>
    %c0_21 = arith.constant 0 : index
    %c0_22 = arith.constant 0 : index
    %c0_23 = arith.constant 0 : index
    %25 = vector.load %arg2[%c0_21, %c0_22, %c0_23] : memref<9x4x4xbf16, #tpu.memory_space<vmem>>, vector<1x4x4xbf16>
    %26 = vector.shape_cast %25 : vector<1x4x4xbf16> to vector<4x4xbf16>
    %cst_24 = arith.constant dense<0.000000e+00> : vector<4x256xf32>
    %27 = tpu.matmul %26, %24, %cst_24 {dimension_numbers = #tpu.dot_dimension_numbers<[1], [0], [0], [1], [0, 0, 1, 1], [], []>} : vector<4x4xbf16>, vector<4x256xbf16>, vector<4x256xf32> -> vector<4x256xf32>
    %28 = arith.addf %20, %27 : vector<4x256xf32>
    %c16_i32 = arith.constant 16 : i32
    %29 = tpu.dynamic_rotate %1 by %c16_i32 dim 1 : vector<4x256xf32>, i32 -> vector<4x256xf32>
    %30 = vector.broadcast %5 : vector<1x256xf32> to vector<4x256xf32>
    %31 = arith.mulf %29, %30 : vector<4x256xf32>
    %32 = arith.truncf %31 : vector<4x256xf32> to vector<4x256xbf16>
    %c1_25 = arith.constant 1 : index
    %c0_26 = arith.constant 0 : index
    %c0_27 = arith.constant 0 : index
    %33 = vector.load %arg2[%c1_25, %c0_26, %c0_27] : memref<9x4x4xbf16, #tpu.memory_space<vmem>>, vector<1x4x4xbf16>
    %34 = vector.shape_cast %33 : vector<1x4x4xbf16> to vector<4x4xbf16>
    %cst_28 = arith.constant dense<0.000000e+00> : vector<4x256xf32>
    %35 = tpu.matmul %34, %32, %cst_28 {dimension_numbers = #tpu.dot_dimension_numbers<[1], [0], [0], [1], [0, 0, 1, 1], [], []>} : vector<4x4xbf16>, vector<4x256xbf16>, vector<4x256xf32> -> vector<4x256xf32>
    %36 = arith.addf %28, %35 : vector<4x256xf32>
    %c15_i32 = arith.constant 15 : i32
    %37 = tpu.dynamic_rotate %1 by %c15_i32 dim 1 : vector<4x256xf32>, i32 -> vector<4x256xf32>
    %38 = vector.broadcast %7 : vector<1x256xf32> to vector<4x256xf32>
    %39 = arith.mulf %37, %38 : vector<4x256xf32>
    %40 = arith.truncf %39 : vector<4x256xf32> to vector<4x256xbf16>
    %c2_29 = arith.constant 2 : index
    %c0_30 = arith.constant 0 : index
    %c0_31 = arith.constant 0 : index
    %41 = vector.load %arg2[%c2_29, %c0_30, %c0_31] : memref<9x4x4xbf16, #tpu.memory_space<vmem>>, vector<1x4x4xbf16>
    %42 = vector.shape_cast %41 : vector<1x4x4xbf16> to vector<4x4xbf16>
    %cst_32 = arith.constant dense<0.000000e+00> : vector<4x256xf32>
    %43 = tpu.matmul %42, %40, %cst_32 {dimension_numbers = #tpu.dot_dimension_numbers<[1], [0], [0], [1], [0, 0, 1, 1], [], []>} : vector<4x4xbf16>, vector<4x256xbf16>, vector<4x256xf32> -> vector<4x256xf32>
    %44 = arith.addf %36, %43 : vector<4x256xf32>
    %c1_i32 = arith.constant 1 : i32
    %45 = tpu.dynamic_rotate %1 by %c1_i32 dim 1 : vector<4x256xf32>, i32 -> vector<4x256xf32>
    %46 = vector.broadcast %9 : vector<1x256xf32> to vector<4x256xf32>
    %47 = arith.mulf %45, %46 : vector<4x256xf32>
    %48 = arith.truncf %47 : vector<4x256xf32> to vector<4x256xbf16>
    %c3_33 = arith.constant 3 : index
    %c0_34 = arith.constant 0 : index
    %c0_35 = arith.constant 0 : index
    %49 = vector.load %arg2[%c3_33, %c0_34, %c0_35] : memref<9x4x4xbf16, #tpu.memory_space<vmem>>, vector<1x4x4xbf16>
    %50 = vector.shape_cast %49 : vector<1x4x4xbf16> to vector<4x4xbf16>
    %cst_36 = arith.constant dense<0.000000e+00> : vector<4x256xf32>
    %51 = tpu.matmul %50, %48, %cst_36 {dimension_numbers = #tpu.dot_dimension_numbers<[1], [0], [0], [1], [0, 0, 1, 1], [], []>} : vector<4x4xbf16>, vector<4x256xbf16>, vector<4x256xf32> -> vector<4x256xf32>
    %52 = arith.addf %44, %51 : vector<4x256xf32>
    %53 = vector.broadcast %11 : vector<1x256xf32> to vector<4x256xf32>
    %54 = arith.mulf %1, %53 : vector<4x256xf32>
    %55 = arith.truncf %54 : vector<4x256xf32> to vector<4x256xbf16>
    %c4_37 = arith.constant 4 : index
    %c0_38 = arith.constant 0 : index
    %c0_39 = arith.constant 0 : index
    %56 = vector.load %arg2[%c4_37, %c0_38, %c0_39] : memref<9x4x4xbf16, #tpu.memory_space<vmem>>, vector<1x4x4xbf16>
    %57 = vector.shape_cast %56 : vector<1x4x4xbf16> to vector<4x4xbf16>
    %cst_40 = arith.constant dense<0.000000e+00> : vector<4x256xf32>
    %58 = tpu.matmul %57, %55, %cst_40 {dimension_numbers = #tpu.dot_dimension_numbers<[1], [0], [0], [1], [0, 0, 1, 1], [], []>} : vector<4x4xbf16>, vector<4x256xbf16>, vector<4x256xf32> -> vector<4x256xf32>
    %59 = arith.addf %52, %58 : vector<4x256xf32>
    %c255_i32 = arith.constant 255 : i32
    %60 = tpu.dynamic_rotate %1 by %c255_i32 dim 1 : vector<4x256xf32>, i32 -> vector<4x256xf32>
    %61 = vector.broadcast %13 : vector<1x256xf32> to vector<4x256xf32>
    %62 = arith.mulf %60, %61 : vector<4x256xf32>
    %63 = arith.truncf %62 : vector<4x256xf32> to vector<4x256xbf16>
    %c5_41 = arith.constant 5 : index
    %c0_42 = arith.constant 0 : index
    %c0_43 = arith.constant 0 : index
    %64 = vector.load %arg2[%c5_41, %c0_42, %c0_43] : memref<9x4x4xbf16, #tpu.memory_space<vmem>>, vector<1x4x4xbf16>
    %65 = vector.shape_cast %64 : vector<1x4x4xbf16> to vector<4x4xbf16>
    %cst_44 = arith.constant dense<0.000000e+00> : vector<4x256xf32>
    %66 = tpu.matmul %65, %63, %cst_44 {dimension_numbers = #tpu.dot_dimension_numbers<[1], [0], [0], [1], [0, 0, 1, 1], [], []>} : vector<4x4xbf16>, vector<4x256xbf16>, vector<4x256xf32> -> vector<4x256xf32>
    %67 = arith.addf %59, %66 : vector<4x256xf32>
    %c241_i32 = arith.constant 241 : i32
    %68 = tpu.dynamic_rotate %1 by %c241_i32 dim 1 : vector<4x256xf32>, i32 -> vector<4x256xf32>
    %69 = vector.broadcast %15 : vector<1x256xf32> to vector<4x256xf32>
    %70 = arith.mulf %68, %69 : vector<4x256xf32>
    %71 = arith.truncf %70 : vector<4x256xf32> to vector<4x256xbf16>
    %c6_45 = arith.constant 6 : index
    %c0_46 = arith.constant 0 : index
    %c0_47 = arith.constant 0 : index
    %72 = vector.load %arg2[%c6_45, %c0_46, %c0_47] : memref<9x4x4xbf16, #tpu.memory_space<vmem>>, vector<1x4x4xbf16>
    %73 = vector.shape_cast %72 : vector<1x4x4xbf16> to vector<4x4xbf16>
    %cst_48 = arith.constant dense<0.000000e+00> : vector<4x256xf32>
    %74 = tpu.matmul %73, %71, %cst_48 {dimension_numbers = #tpu.dot_dimension_numbers<[1], [0], [0], [1], [0, 0, 1, 1], [], []>} : vector<4x4xbf16>, vector<4x256xbf16>, vector<4x256xf32> -> vector<4x256xf32>
    %75 = arith.addf %67, %74 : vector<4x256xf32>
    %c240_i32 = arith.constant 240 : i32
    %76 = tpu.dynamic_rotate %1 by %c240_i32 dim 1 : vector<4x256xf32>, i32 -> vector<4x256xf32>
    %77 = vector.broadcast %17 : vector<1x256xf32> to vector<4x256xf32>
    %78 = arith.mulf %76, %77 : vector<4x256xf32>
    %79 = arith.truncf %78 : vector<4x256xf32> to vector<4x256xbf16>
    %c7_49 = arith.constant 7 : index
    %c0_50 = arith.constant 0 : index
    %c0_51 = arith.constant 0 : index
    %80 = vector.load %arg2[%c7_49, %c0_50, %c0_51] : memref<9x4x4xbf16, #tpu.memory_space<vmem>>, vector<1x4x4xbf16>
    %81 = vector.shape_cast %80 : vector<1x4x4xbf16> to vector<4x4xbf16>
    %cst_52 = arith.constant dense<0.000000e+00> : vector<4x256xf32>
    %82 = tpu.matmul %81, %79, %cst_52 {dimension_numbers = #tpu.dot_dimension_numbers<[1], [0], [0], [1], [0, 0, 1, 1], [], []>} : vector<4x4xbf16>, vector<4x256xbf16>, vector<4x256xf32> -> vector<4x256xf32>
    %83 = arith.addf %75, %82 : vector<4x256xf32>
    %c239_i32 = arith.constant 239 : i32
    %84 = tpu.dynamic_rotate %1 by %c239_i32 dim 1 : vector<4x256xf32>, i32 -> vector<4x256xf32>
    %85 = vector.broadcast %19 : vector<1x256xf32> to vector<4x256xf32>
    %86 = arith.mulf %84, %85 : vector<4x256xf32>
    %87 = arith.truncf %86 : vector<4x256xf32> to vector<4x256xbf16>
    %c8_53 = arith.constant 8 : index
    %c0_54 = arith.constant 0 : index
    %c0_55 = arith.constant 0 : index
    %88 = vector.load %arg2[%c8_53, %c0_54, %c0_55] : memref<9x4x4xbf16, #tpu.memory_space<vmem>>, vector<1x4x4xbf16>
    %89 = vector.shape_cast %88 : vector<1x4x4xbf16> to vector<4x4xbf16>
    %cst_56 = arith.constant dense<0.000000e+00> : vector<4x256xf32>
    %90 = tpu.matmul %89, %87, %cst_56 {dimension_numbers = #tpu.dot_dimension_numbers<[1], [0], [0], [1], [0, 0, 1, 1], [], []>} : vector<4x4xbf16>, vector<4x256xbf16>, vector<4x256xf32> -> vector<4x256xf32>
    %91 = arith.addf %83, %90 : vector<4x256xf32>
    %c0_57 = arith.constant 0 : index
    %c0_58 = arith.constant 0 : index
    %92 = vector.load %arg5[%c0_57, %c0_58] : memref<4x1xf32, #tpu.memory_space<vmem>>, vector<4x1xf32>
    %93 = vector.broadcast %92 : vector<4x1xf32> to vector<4x256xf32>
    %94 = arith.mulf %91, %93 : vector<4x256xf32>
    %c0_59 = arith.constant 0 : index
    %c0_60 = arith.constant 0 : index
    %95 = vector.load %arg6[%c0_59, %c0_60] : memref<4x1xf32, #tpu.memory_space<vmem>>, vector<4x1xf32>
    %96 = vector.broadcast %95 : vector<4x1xf32> to vector<4x256xf32>
    %97 = arith.addf %94, %96 : vector<4x256xf32>
    %cst_61 = arith.constant 0.000000e+00 : f32
    %98 = vector.broadcast %cst_61 : f32 to vector<4x256xf32>
    %99 = arith.maximumf %97, %98 : vector<4x256xf32>
    %cst_62 = arith.constant 0.000000e+00 : f32
    %100 = vector.broadcast %cst_62 : f32 to vector<4x256xf32>
    %c17_i32_63 = arith.constant 17 : i32
    %101 = tpu.dynamic_rotate %99 by %c17_i32_63 dim 1 : vector<4x256xf32>, i32 -> vector<4x256xf32>
    %102 = vector.broadcast %3 : vector<1x256xf32> to vector<4x256xf32>
    %103 = arith.mulf %101, %102 : vector<4x256xf32>
    %104 = arith.truncf %103 : vector<4x256xf32> to vector<4x256xbf16>
    %c0_64 = arith.constant 0 : index
    %c0_65 = arith.constant 0 : index
    %c0_66 = arith.constant 0 : index
    %105 = vector.load %arg3[%c0_64, %c0_65, %c0_66] : memref<9x4x4xbf16, #tpu.memory_space<vmem>>, vector<1x4x4xbf16>
    %106 = vector.shape_cast %105 : vector<1x4x4xbf16> to vector<4x4xbf16>
    %cst_67 = arith.constant dense<0.000000e+00> : vector<4x256xf32>
    %107 = tpu.matmul %106, %104, %cst_67 {dimension_numbers = #tpu.dot_dimension_numbers<[1], [0], [0], [1], [0, 0, 1, 1], [], []>} : vector<4x4xbf16>, vector<4x256xbf16>, vector<4x256xf32> -> vector<4x256xf32>
    %108 = arith.addf %100, %107 : vector<4x256xf32>
    %c16_i32_68 = arith.constant 16 : i32
    %109 = tpu.dynamic_rotate %99 by %c16_i32_68 dim 1 : vector<4x256xf32>, i32 -> vector<4x256xf32>
    %110 = vector.broadcast %5 : vector<1x256xf32> to vector<4x256xf32>
    %111 = arith.mulf %109, %110 : vector<4x256xf32>
    %112 = arith.truncf %111 : vector<4x256xf32> to vector<4x256xbf16>
    %c1_69 = arith.constant 1 : index
    %c0_70 = arith.constant 0 : index
    %c0_71 = arith.constant 0 : index
    %113 = vector.load %arg3[%c1_69, %c0_70, %c0_71] : memref<9x4x4xbf16, #tpu.memory_space<vmem>>, vector<1x4x4xbf16>
    %114 = vector.shape_cast %113 : vector<1x4x4xbf16> to vector<4x4xbf16>
    %cst_72 = arith.constant dense<0.000000e+00> : vector<4x256xf32>
    %115 = tpu.matmul %114, %112, %cst_72 {dimension_numbers = #tpu.dot_dimension_numbers<[1], [0], [0], [1], [0, 0, 1, 1], [], []>} : vector<4x4xbf16>, vector<4x256xbf16>, vector<4x256xf32> -> vector<4x256xf32>
    %116 = arith.addf %108, %115 : vector<4x256xf32>
    %c15_i32_73 = arith.constant 15 : i32
    %117 = tpu.dynamic_rotate %99 by %c15_i32_73 dim 1 : vector<4x256xf32>, i32 -> vector<4x256xf32>
    %118 = vector.broadcast %7 : vector<1x256xf32> to vector<4x256xf32>
    %119 = arith.mulf %117, %118 : vector<4x256xf32>
    %120 = arith.truncf %119 : vector<4x256xf32> to vector<4x256xbf16>
    %c2_74 = arith.constant 2 : index
    %c0_75 = arith.constant 0 : index
    %c0_76 = arith.constant 0 : index
    %121 = vector.load %arg3[%c2_74, %c0_75, %c0_76] : memref<9x4x4xbf16, #tpu.memory_space<vmem>>, vector<1x4x4xbf16>
    %122 = vector.shape_cast %121 : vector<1x4x4xbf16> to vector<4x4xbf16>
    %cst_77 = arith.constant dense<0.000000e+00> : vector<4x256xf32>
    %123 = tpu.matmul %122, %120, %cst_77 {dimension_numbers = #tpu.dot_dimension_numbers<[1], [0], [0], [1], [0, 0, 1, 1], [], []>} : vector<4x4xbf16>, vector<4x256xbf16>, vector<4x256xf32> -> vector<4x256xf32>
    %124 = arith.addf %116, %123 : vector<4x256xf32>
    %c1_i32_78 = arith.constant 1 : i32
    %125 = tpu.dynamic_rotate %99 by %c1_i32_78 dim 1 : vector<4x256xf32>, i32 -> vector<4x256xf32>
    %126 = vector.broadcast %9 : vector<1x256xf32> to vector<4x256xf32>
    %127 = arith.mulf %125, %126 : vector<4x256xf32>
    %128 = arith.truncf %127 : vector<4x256xf32> to vector<4x256xbf16>
    %c3_79 = arith.constant 3 : index
    %c0_80 = arith.constant 0 : index
    %c0_81 = arith.constant 0 : index
    %129 = vector.load %arg3[%c3_79, %c0_80, %c0_81] : memref<9x4x4xbf16, #tpu.memory_space<vmem>>, vector<1x4x4xbf16>
    %130 = vector.shape_cast %129 : vector<1x4x4xbf16> to vector<4x4xbf16>
    %cst_82 = arith.constant dense<0.000000e+00> : vector<4x256xf32>
    %131 = tpu.matmul %130, %128, %cst_82 {dimension_numbers = #tpu.dot_dimension_numbers<[1], [0], [0], [1], [0, 0, 1, 1], [], []>} : vector<4x4xbf16>, vector<4x256xbf16>, vector<4x256xf32> -> vector<4x256xf32>
    %132 = arith.addf %124, %131 : vector<4x256xf32>
    %133 = vector.broadcast %11 : vector<1x256xf32> to vector<4x256xf32>
    %134 = arith.mulf %99, %133 : vector<4x256xf32>
    %135 = arith.truncf %134 : vector<4x256xf32> to vector<4x256xbf16>
    %c4_83 = arith.constant 4 : index
    %c0_84 = arith.constant 0 : index
    %c0_85 = arith.constant 0 : index
    %136 = vector.load %arg3[%c4_83, %c0_84, %c0_85] : memref<9x4x4xbf16, #tpu.memory_space<vmem>>, vector<1x4x4xbf16>
    %137 = vector.shape_cast %136 : vector<1x4x4xbf16> to vector<4x4xbf16>
    %cst_86 = arith.constant dense<0.000000e+00> : vector<4x256xf32>
    %138 = tpu.matmul %137, %135, %cst_86 {dimension_numbers = #tpu.dot_dimension_numbers<[1], [0], [0], [1], [0, 0, 1, 1], [], []>} : vector<4x4xbf16>, vector<4x256xbf16>, vector<4x256xf32> -> vector<4x256xf32>
    %139 = arith.addf %132, %138 : vector<4x256xf32>
    %c255_i32_87 = arith.constant 255 : i32
    %140 = tpu.dynamic_rotate %99 by %c255_i32_87 dim 1 : vector<4x256xf32>, i32 -> vector<4x256xf32>
    %141 = vector.broadcast %13 : vector<1x256xf32> to vector<4x256xf32>
    %142 = arith.mulf %140, %141 : vector<4x256xf32>
    %143 = arith.truncf %142 : vector<4x256xf32> to vector<4x256xbf16>
    %c5_88 = arith.constant 5 : index
    %c0_89 = arith.constant 0 : index
    %c0_90 = arith.constant 0 : index
    %144 = vector.load %arg3[%c5_88, %c0_89, %c0_90] : memref<9x4x4xbf16, #tpu.memory_space<vmem>>, vector<1x4x4xbf16>
    %145 = vector.shape_cast %144 : vector<1x4x4xbf16> to vector<4x4xbf16>
    %cst_91 = arith.constant dense<0.000000e+00> : vector<4x256xf32>
    %146 = tpu.matmul %145, %143, %cst_91 {dimension_numbers = #tpu.dot_dimension_numbers<[1], [0], [0], [1], [0, 0, 1, 1], [], []>} : vector<4x4xbf16>, vector<4x256xbf16>, vector<4x256xf32> -> vector<4x256xf32>
    %147 = arith.addf %139, %146 : vector<4x256xf32>
    %c241_i32_92 = arith.constant 241 : i32
    %148 = tpu.dynamic_rotate %99 by %c241_i32_92 dim 1 : vector<4x256xf32>, i32 -> vector<4x256xf32>
    %149 = vector.broadcast %15 : vector<1x256xf32> to vector<4x256xf32>
    %150 = arith.mulf %148, %149 : vector<4x256xf32>
    %151 = arith.truncf %150 : vector<4x256xf32> to vector<4x256xbf16>
    %c6_93 = arith.constant 6 : index
    %c0_94 = arith.constant 0 : index
    %c0_95 = arith.constant 0 : index
    %152 = vector.load %arg3[%c6_93, %c0_94, %c0_95] : memref<9x4x4xbf16, #tpu.memory_space<vmem>>, vector<1x4x4xbf16>
    %153 = vector.shape_cast %152 : vector<1x4x4xbf16> to vector<4x4xbf16>
    %cst_96 = arith.constant dense<0.000000e+00> : vector<4x256xf32>
    %154 = tpu.matmul %153, %151, %cst_96 {dimension_numbers = #tpu.dot_dimension_numbers<[1], [0], [0], [1], [0, 0, 1, 1], [], []>} : vector<4x4xbf16>, vector<4x256xbf16>, vector<4x256xf32> -> vector<4x256xf32>
    %155 = arith.addf %147, %154 : vector<4x256xf32>
    %c240_i32_97 = arith.constant 240 : i32
    %156 = tpu.dynamic_rotate %99 by %c240_i32_97 dim 1 : vector<4x256xf32>, i32 -> vector<4x256xf32>
    %157 = vector.broadcast %17 : vector<1x256xf32> to vector<4x256xf32>
    %158 = arith.mulf %156, %157 : vector<4x256xf32>
    %159 = arith.truncf %158 : vector<4x256xf32> to vector<4x256xbf16>
    %c7_98 = arith.constant 7 : index
    %c0_99 = arith.constant 0 : index
    %c0_100 = arith.constant 0 : index
    %160 = vector.load %arg3[%c7_98, %c0_99, %c0_100] : memref<9x4x4xbf16, #tpu.memory_space<vmem>>, vector<1x4x4xbf16>
    %161 = vector.shape_cast %160 : vector<1x4x4xbf16> to vector<4x4xbf16>
    %cst_101 = arith.constant dense<0.000000e+00> : vector<4x256xf32>
    %162 = tpu.matmul %161, %159, %cst_101 {dimension_numbers = #tpu.dot_dimension_numbers<[1], [0], [0], [1], [0, 0, 1, 1], [], []>} : vector<4x4xbf16>, vector<4x256xbf16>, vector<4x256xf32> -> vector<4x256xf32>
    %163 = arith.addf %155, %162 : vector<4x256xf32>
    %c239_i32_102 = arith.constant 239 : i32
    %164 = tpu.dynamic_rotate %99 by %c239_i32_102 dim 1 : vector<4x256xf32>, i32 -> vector<4x256xf32>
    %165 = vector.broadcast %19 : vector<1x256xf32> to vector<4x256xf32>
    %166 = arith.mulf %164, %165 : vector<4x256xf32>
    %167 = arith.truncf %166 : vector<4x256xf32> to vector<4x256xbf16>
    %c8_103 = arith.constant 8 : index
    %c0_104 = arith.constant 0 : index
    %c0_105 = arith.constant 0 : index
    %168 = vector.load %arg3[%c8_103, %c0_104, %c0_105] : memref<9x4x4xbf16, #tpu.memory_space<vmem>>, vector<1x4x4xbf16>
    %169 = vector.shape_cast %168 : vector<1x4x4xbf16> to vector<4x4xbf16>
    %cst_106 = arith.constant dense<0.000000e+00> : vector<4x256xf32>
    %170 = tpu.matmul %169, %167, %cst_106 {dimension_numbers = #tpu.dot_dimension_numbers<[1], [0], [0], [1], [0, 0, 1, 1], [], []>} : vector<4x4xbf16>, vector<4x256xbf16>, vector<4x256xf32> -> vector<4x256xf32>
    %171 = arith.addf %163, %170 : vector<4x256xf32>
    %c0_107 = arith.constant 0 : index
    %c0_108 = arith.constant 0 : index
    %172 = vector.load %arg7[%c0_107, %c0_108] : memref<4x1xf32, #tpu.memory_space<vmem>>, vector<4x1xf32>
    %173 = vector.broadcast %172 : vector<4x1xf32> to vector<4x256xf32>
    %174 = arith.mulf %171, %173 : vector<4x256xf32>
    %c0_109 = arith.constant 0 : index
    %c0_110 = arith.constant 0 : index
    %175 = vector.load %arg8[%c0_109, %c0_110] : memref<4x1xf32, #tpu.memory_space<vmem>>, vector<4x1xf32>
    %176 = vector.broadcast %175 : vector<4x1xf32> to vector<4x256xf32>
    %177 = arith.addf %174, %176 : vector<4x256xf32>
    %178 = arith.addf %177, %1 : vector<4x256xf32>
    %cst_111 = arith.constant 0.000000e+00 : f32
    %179 = vector.broadcast %cst_111 : f32 to vector<4x256xf32>
    %180 = arith.maximumf %178, %179 : vector<4x256xf32>
    %c0_112 = arith.constant 0 : index
    %c0_113 = arith.constant 0 : index
    %c0_114 = arith.constant 0 : index
    %181 = vector.load %arg9[%c0_112, %c0_113, %c0_114] : memref<1x4x256xf32, #tpu.memory_space<vmem>>, vector<1x4x256xf32>
    %182 = vector.shape_cast %181 : vector<1x4x256xf32> to vector<4x256xf32>
    %183 = vector.shape_cast %180 : vector<4x256xf32> to vector<1x4x256xf32>
    tpu.vector_store %arg9[%c0_112, %c0_113, %c0_114], %183 {strides = array<i32>} : memref<1x4x256xf32, #tpu.memory_space<vmem>>, vector<1x4x256xf32>,
    return
  }
  func.func @transform_0(%arg0: i32) -> (i32, i32, i32) {
    %c0_i32 = arith.constant 0 : i32
    %c0_i32_0 = arith.constant 0 : i32
    %c0_i32_1 = arith.constant 0 : i32
    return %arg0, %c0_i32, %c0_i32_0 : i32, i32, i32
  }
  func.func @transform_1(%arg0: i32) -> (i32, i32, i32) {
    %c0_i32 = arith.constant 0 : i32
    %c0_i32_0 = arith.constant 0 : i32
    %c0_i32_1 = arith.constant 0 : i32
    %c0_i32_2 = arith.constant 0 : i32
    return %c0_i32, %c0_i32_0, %c0_i32_1 : i32, i32, i32
  }
  func.func @transform_2(%arg0: i32) -> (i32, i32, i32) {
    %c0_i32 = arith.constant 0 : i32
    %c0_i32_0 = arith.constant 0 : i32
    %c0_i32_1 = arith.constant 0 : i32
    %c0_i32_2 = arith.constant 0 : i32
    return %c0_i32, %c0_i32_0, %c0_i32_1 : i32, i32, i32
  }
  func.func @transform_3(%arg0: i32) -> (i32, i32, i32) {
    %c0_i32 = arith.constant 0 : i32
    %c0_i32_0 = arith.constant 0 : i32
    %c0_i32_1 = arith.constant 0 : i32
    %c0_i32_2 = arith.constant 0 : i32
    return %c0_i32, %c0_i32_0, %c0_i32_1 : i32, i32, i32
  }
  func.func @transform_4(%arg0: i32) -> (i32, i32) {
    %c0_i32 = arith.constant 0 : i32
    %c0_i32_0 = arith.constant 0 : i32
    %c0_i32_1 = arith.constant 0 : i32
    return %c0_i32, %c0_i32_0 : i32, i32
  }
  func.func @transform_5(%arg0: i32) -> (i32, i32) {
    %c0_i32 = arith.constant 0 : i32
    %c0_i32_0 = arith.constant 0 : i32
    %c0_i32_1 = arith.constant 0 : i32
    return %c0_i32, %c0_i32_0 : i32, i32
  }
  func.func @transform_6(%arg0: i32) -> (i32, i32) {
    %c0_i32 = arith.constant 0 : i32
    %c0_i32_0 = arith.constant 0 : i32
    %c0_i32_1 = arith.constant 0 : i32
    return %c0_i32, %c0_i32_0 : i32, i32
  }
  func.func @transform_7(%arg0: i32) -> (i32, i32) {
    %c0_i32 = arith.constant 0 : i32
    %c0_i32_0 = arith.constant 0 : i32
    %c0_i32_1 = arith.constant 0 : i32
    return %c0_i32, %c0_i32_0 : i32, i32
  }
  func.func @transform_8(%arg0: i32) -> (i32, i32, i32) {
    %c0_i32 = arith.constant 0 : i32
    %c0_i32_0 = arith.constant 0 : i32
    %c0_i32_1 = arith.constant 0 : i32
    return %arg0, %c0_i32, %c0_i32_0 : i32, i32, i32
  }
}

</mosaic_0001>

<bundles_post_ra>
// kernel: tpu_custom_call.1
= control target key start
LH: loop header
LB: loop body
LE: loop exit
PB: predicated region body
PF: predicated region fallthrough
CT: control target
= control target key end

     0   :  { %13 = vsyncpa [#allocation3], 0  ;;  %s2510_s0 = inlined_call_operand.vmem [shape: f32[2,4,256], index: 0, kind: input, shape index: {}]   ;;  %s2511_s1 = inlined_call_operand.vmem [shape: bf16[9,4,4], index: 1, kind: input, shape index: {}]   ;;  %s2512_s2 = inlined_call_operand.vmem [shape: bf16[9,4,4], index: 2, kind: input, shape index: {}]   ;;  %s2513_s3 = inlined_call_operand.vmem [shape: f32[9,1,256], index: 3, kind: input, shape index: {}]   ;;  %s2514_s4 = inlined_call_operand.vmem [shape: f32[4,1], index: 4, kind: input, shape index: {}]   ;;  %s2515_s5 = inlined_call_operand.vmem [shape: f32[4,1], index: 5, kind: input, shape index: {}]   ;;  %s2516_s6 = inlined_call_operand.vmem [shape: f32[4,1], index: 6, kind: input, shape index: {}]   ;;  %s2517_s7 = inlined_call_operand.vmem [shape: f32[4,1], index: 7, kind: input, shape index: {}]   ;;  %s2518_s8 = inlined_call_operand.hbm [shape: f32[2,4,256], index: 8, kind: output, shape index: {}]  }
   0x1   :  { %15 = vsyncpa [#allocation3 + $0x1], 0  ;;  %s1996_s27 = smov 0   ;;  %s1998_s28 = smov 0  }
   0x2   :  { %s2000_s29 = smov 0   ;;  %s2002_s30 = smov 0  }
   0x3 LB: > { %s2017_s9 = sadd.s32 4294967295, %s1939_s30   ;;  %s1688_s10 = sadd.s32 4294967294, %s1939_s30   ;;  %s1939_s30 = sphi %s2002_s30, %s2527_s30   ;;  %s1935_s29 = sphi %s2000_s29, %s2526_s29   ;;  %s1931_s28 = sphi %s1998_s28, %s2525_s28   ;;  %s1927_s27 = sphi %s1996_s27, %s2524_s27  }
   0x4   : > { %s2021_s11 = sadd.s32 1, %s1939_s30   ;;  %s201_s12 = sadd.s32 1, %s1935_s29 }
   0x5   : > { %s198_s13 = ssub.s32 %s1939_s30, %s2021_s11  ;;  %p211_p0 = scmp.ne.s32.totalorder %s1935_s29, %s1931_s28 }
   0x6   : > { %p199_p1 = scmp.eq.s32.totalorder %s198_s13, 0  ;;  %p212_p2 = scmp.eq.s32.totalorder %s2017_s9, 1 }
   0x7   : > { %p217_p3 = scmp.ne.s32.totalorder %s1931_s28, %s1927_s27  ;;  %p218_p4 = scmp.eq.s32.totalorder %s1688_s10, 1 }
   0x8   : > { %s2032_s14 = scalar_select %p199_p1, %s1935_s29, %s201_s12  }
   0x9   : > { %p2034_p5 = por %p212_p2, %p211_p0  ;;  %p2038_p6 = por %p218_p4, %p217_p3 }
   0xa   : > { %p1691_p7 = scmp.ge.s32.totalorder %s1939_s30, 1  ;;  %p265_p8 = scmp.lt.s32.totalorder %s1939_s30, 3 }
   0xc   : > { %p266_p9 = pnand %p1691_p7, %p265_p8 }
   0xd   : > { %p299_p10 = scmp.lt.s32.totalorder (!%p266_p9), %s2017_s9, 1  ;;  %v1941_v1 = vmov (!%p266_p9), 0   ;;  %s1942_s22 = smov (!%p266_p9), 17   ;;  %v1006_v3 = vld [vmem:[%s2514_s4] sm:$0xf] (!%p266_p9)  ;;  %v330_v5 = vlaneseq (!%p266_p9)  ;;  %vm379_vm3 = vcmask (!%p266_p9), 1041408  }
   0xe   : > { %269 = sbr.rel (%p266_p9) target bundleno = 926 (0x39e), region = 52  ;;  %418 = vmatprep.mubr.bf16.mxu0 (!%p266_p9), %v1941_v1  ;;  %s1943_s23 = smov (!%p266_p9), 16   ;;  %1874 = vset.pattern.permute.xlu0 (!%p266_p9), %v1941_v1  ;;  %v1014_v4 = vld [vmem:[%s2515_s5] sm:$0xf] (!%p266_p9)  ;;  %v1696_v14 = vld [vmem:[%s2513_s3 + $0x4] sm:$0x3] (!%p266_p9) }
   0xf   : > { %1875 = vset.pattern.permute.xlu1 (!%p266_p9), %v1941_v1  ;;  %1088 = vmatprep.mubr.bf16.mxu1 (!%p266_p9), %v1941_v1  ;;  %s1944_s24 = smov (!%p266_p9), 15   ;;  %s1945_s25 = smov (!%p266_p9), 1   ;;  %v337_v6 = vshrl.u32 (!%p266_p9), %v330_v5, 7  ;;  %v2097_v7 = vand.u32 (!%p266_p9), 127, %v330_v5  ;;  %v306_v10 = vld [vmem:[%s2513_s3] sm:$0x3] (!%p266_p9) }
  0x10   : > { %s1946_s26 = smov (!%p266_p9), 127   ;;  %s1947_s10 = smov (!%p266_p9), 113   ;;  %v1695_v11 = vld [vmem:[%s2513_s3 + $0x2] sm:$0x3] (!%p266_p9)  ;;  %vm375_vm4 = vcmask (!%p266_p9), 31744  }
  0x11   : > { %s1948_s12 = smov (!%p266_p9), 112   ;;  %s2519_s13 = smov (!%p266_p9), 111   ;;  %v2099_v8 = vsub.s32 (!%p266_p9), 0, %v337_v6  ;;  %v2101_v9 = vsub.s32 (!%p266_p9), 1, %v337_v6  ;;  %vm332_vm0 = vcmp.lt.s32.totalorder (!%p266_p9), %v2097_v7, 17  ;;  %vm355_vm1 = vcmp.lt.s32.totalorder (!%p266_p9), %v2097_v7, 16 }
  0x12   : > { %vm481_vm2 = vcmp.lt.s32.totalorder (!%p266_p9), %v2097_v7, 15  ;;  %v1703_v39 = vld [vmem:[%s2511_s1 + $0x2] sm:$0x3] (!%p266_p9)  ;;  %v1697_v44 = vld [vmem:[%s2513_s3 + $0x6] sm:$0x3] (!%p266_p9)  ;;  %vm557_vm5 = vcmp.lt.s32.totalorder (!%p266_p9), %v2097_v7, 1 }
  0x13   : > { %v2115_v15 = vrot.slane (!%p266_p9), %v306_v10, %v2099_v8  ;;  %v2118_v16 = vrot.slane (!%p266_p9), %v306_v10, %v2101_v9  ;;  %v2121_v17 = vrot.slane (!%p266_p9), %v1695_v11, %v2099_v8  ;;  %v2124_v18 = vrot.slane (!%p266_p9), %v1695_v11, %v2101_v9  ;;  %v1698_v50 = vld [vmem:[%s2513_s3 + $0x8] sm:$0x3] (!%p266_p9)  ;;  %v350_v55 = vld [vmem:[%s2511_s1] sm:$0x3] (!%p266_p9)  ;;  %v1699_v10 = vld [vmem:[%s2513_s3 + $0xa] sm:$0x3] (!%p266_p9) }
  0x14   : > { %v2128_v21 = vrot.slane (!%p266_p9), %v1696_v14, %v2101_v9  ;;  %v2153_v41 = vrot.slane (!%p266_p9), %v1696_v14, %v2099_v8  ;;  %v2166_v48 = vrot.slane (!%p266_p9), %v1697_v44, %v2101_v9  ;;  %v2175_v53 = vrot.slane (!%p266_p9), %v1698_v50, %v2099_v8  ;;  %s1761_s20 = sshll.u32 (!%p266_p9), %s2017_s9, 7 }
  0x15   : > { %s300_s17 = scalar_select %p299_p10, %s2017_s9, 1  ;;  %v2178_v54 = vrot.slane %v1698_v50, %v2101_v9  ;;  %v2185_v57 = vrot.slane %v1697_v44, %v2099_v8  ;;  %vm706_vm6 = vcmp.lt.s32.totalorder %v2097_v7, 127  ;;  %vm782_vm7 = vcmp.lt.s32.totalorder %v2097_v7, 113  ;;  %v1717_v50 = vld [vmem:[%s2511_s1 + $0xa] sm:$0x3] }
  0x16   : > { %vm858_vm8 = vcmp.lt.s32.totalorder %v2097_v7, 112  ;;  %vm934_vm9 = vcmp.lt.s32.totalorder %v2097_v7, 111  ;;  %v1752_v7 = vld [vmem:[%s2512_s2 + $0x10] sm:$0x3]  ;;  %s1950_s9 = smov [#allocation2]  }
  0x17   : > { %s1760_s18 = sshll.u32 %s300_s17, 3  ;;  %v640_v59 = vcombine.low %v2175_v53, %v2178_v54 }
  0x18   : > { %s303_s21 = scalar_lea.vmem %s2510_s0, %s1760_s18  ;;  %s296_s18 = sand.u32 1, %s1931_s28  }
  0x19   : > { %v2049_v0 = vld [vmem:[%s303_s21] sm:$0xff]  ;;  %s1692_s19 = sshll.u32 %s296_s18, 3 }
  0x1a   : > { %326 = vrot.lane.b32.xlu1 %v2049_v0, %s1942_s22  ;;  %351 = vrot.lane.b32.xlu0 %v2049_v0, %s1943_s23  ;;  %v2058_v2 = vcombine.high %v2049_v0, %v2049_v0  ;;  %v642_v62 = vmul.f32 %v640_v59, %v2049_v0 }
  0x1e   : > { %328 = vrot.lane.b32.xlu1 %v2058_v2, %s1942_s22  ;;  %353 = vrot.lane.b32.xlu0 %v2058_v2, %s1943_s23 }
  0x22   : > { %479 = vrot.lane.b32.xlu1 %v2058_v2, %s1944_s24  ;;  %477 = vrot.lane.b32.xlu0 %v2049_v0, %s1944_s24 }
  0x26   : > { %555 = vrot.lane.b32.xlu1 %v2058_v2, %s1945_s25  ;;  %553 = vrot.lane.b32.xlu0 %v2049_v0, %s1945_s25 }
  0x2a   : > { %704 = vrot.lane.b32.xlu1 %v2058_v2, %s1946_s26  ;;  %702 = vrot.lane.b32.xlu0 %v2049_v0, %s1946_s26 }
  0x2e   : > { %780 = vrot.lane.b32.xlu1 %v2058_v2, %s1947_s10  ;;  %778 = vrot.lane.b32.xlu0 %v2049_v0, %s1947_s10 }
  0x32   : > { %856 = vrot.lane.b32.xlu1 %v2058_v2, %s1948_s12  ;;  %854 = vrot.lane.b32.xlu0 %v2049_v0, %s1948_s12 }
  0x36   : > { %932 = vrot.lane.b32.xlu1 %v2058_v2, %s2519_s13  ;;  %930 = vrot.lane.b32.xlu0 %v2049_v0, %s2519_s13  ;;  %s1881_s13 = sshll.u32 %s1950_s9, 4  ;;  %s1882_s13 = int_to_ptr.vmem [resolvable:$false] %s1881_s13 }
  0x37   : > { %s1883_s21 = scalar_lea.vmem %s1882_s13, 256 }
  0x3a   : > { %1009 = vperm.xlu0 %1874, %v1006_v3   ;;  %1017 = vperm.xlu1 %1875, %v1014_v4   ;;  %v644_v3 = vcombine.high %v642_v62, %v642_v62  ;;  %v1708_v4 = vld [vmem:[%s2511_s1 + $0x4] sm:$0x3] }
  0x3c   : > { %v647_v6 = vpack.c.bf16 %v644_v3, %v644_v3 }
  0x8c   : > { %v327_v12 = vpop.permute.xlu1 %326  ;;  %v352_v13 = vpop.permute.xlu0 %351 }
  0x90   : > { %v329_v19 = vpop.permute.xlu1 %328  ;;  %v354_v20 = vpop.permute.xlu0 %353 }
  0x91   : > { %v333_v22 = vsel %vm332_vm0, %v327_v12, %v329_v19  ;;  %v334_v23 = vsel %vm332_vm0, %v329_v19, %v327_v12  ;;  %v356_v24 = vsel %vm355_vm1, %v352_v13, %v354_v20  ;;  %v357_v25 = vsel %vm355_vm1, %v354_v20, %v352_v13 }
  0x92   : > { %v346_v26 = vmul.f32 %v2115_v15, %v334_v23  ;;  %v347_v27 = vmul.f32 %v2118_v16, %v333_v22  ;;  %v369_v28 = vmul.f32 %v2121_v17, %v357_v25  ;;  %v370_v29 = vmul.f32 %v2124_v18, %v356_v24  ;;  %v1711_v22 = vld [vmem:[%s2511_s1 + $0x6] sm:$0x3] }
  0x93   : > { %v2208_v13 = vrot.slane %v1699_v10, %v2101_v9  ;;  %v646_v19 = vpack.c.bf16 %v642_v62, %v642_v62  ;;  %v2218_v24 = vrot.slane %v1699_v10, %v2099_v8 }
  0x94   : > { %v348_v30 = vpack.c.bf16 %v346_v26, %v346_v26  ;;  %v349_v31 = vpack.c.bf16 %v347_v27, %v347_v27  ;;  %v372_v32 = vpack.c.bf16 %v370_v29, %v370_v29  ;;  %v371_v33 = vpack.c.bf16 %v369_v28, %v369_v28  ;;  %v480_v34 = vpop.permute.xlu1 %479  ;;  %v478_v35 = vpop.permute.xlu0 %477  ;;  %v1700_v27 = vld [vmem:[%s2513_s3 + $0xc] sm:$0x3] }
  0x95   : > { %v482_v36 = vsel %vm481_vm2, %v478_v35, %v480_v34  ;;  %v483_v43 = vsel %vm481_vm2, %v480_v34, %v478_v35  ;;  %v654_v23 = vsel %vm379_vm3, %v646_v19, 0  ;;  %v1714_v35 = vld [vmem:[%s2511_s1 + $0x8] sm:$0x3]  ;;  %v1723_v19 = vld [vmem:[%s2511_s1 + $0xe] sm:$0x3] }
  0x96   : > { %1704 = vmatprep.subr.msk.bf16.mxu0 %vm379_vm3, %v372_v32  ;;  %v381_v37 = vsel %vm379_vm3, %v371_v33, 0  ;;  %v496_v38 = vmul.f32 %v2128_v21, %v482_v36  ;;  %v431_v40 = vsel %vm379_vm3, %v348_v30, 0  ;;  %v495_v47 = vmul.f32 %v2153_v41, %v483_v43 }
  0x97   : > { %387 = vmatpush1.bf16.msra.mxu0 %v381_v37  ;;  %v2241_v37 = vrot.slane %v1700_v27, %v2099_v8 }
  0x98   : > { %1706 = vmatprep.subr.msk.bf16.mxu0 %vm379_vm3, %v349_v31  ;;  %v498_v42 = vpack.c.bf16 %v496_v38, %v496_v38  ;;  %v556_v45 = vpop.permute.xlu1 %555  ;;  %v554_v46 = vpop.permute.xlu0 %553  ;;  %v497_v51 = vpack.c.bf16 %v495_v47, %v495_v47  ;;  %v2231_v31 = vrot.slane %v1700_v27, %v2101_v9 }
  0x99   : > { %v558_v49 = vsel %vm557_vm5, %v554_v46, %v556_v45  ;;  %v559_v60 = vsel %vm557_vm5, %v556_v45, %v554_v46 }
  0x9a   : > { %1705 = vmatmul.mubr.msk.bf16.vlgmr.msra.gmra.mrb[0].mxu0 %vm375_vm4, %v1703_v39  ;;  %v572_v52 = vmul.f32 %v2166_v48, %v558_v49  ;;  %v505_v56 = vsel %vm379_vm3, %v497_v51, 0  ;;  %v571_v61 = vmul.f32 %v2185_v57, %v559_v60 }
  0x9b   : > { %437 = vmatpush1.bf16.msra.mxu0 %v431_v40  ;;  %468 = vmatprep.mubr.bf16.mxu0 %v1941_v1  ;;  %v1701_v40 = vld [vmem:[%s2513_s3 + $0xe] sm:$0x3] }
  0x9c   : > { %1709 = vmatprep.subr.msk.bf16.mxu0 %vm379_vm3, %v498_v42  ;;  %v574_v58 = vpack.c.bf16 %v572_v52, %v572_v52  ;;  %v573_v63 = vpack.c.bf16 %v571_v61, %v571_v61  ;;  %v705_v11 = vpop.permute.xlu1 %704  ;;  %v703_v12 = vpop.permute.xlu0 %702  ;;  %v2254_v45 = vrot.slane %v1701_v40, %v2101_v9  ;;  %v2264_v52 = vrot.slane %v1701_v40, %v2099_v8 }
  0x9d   : > { %v708_v14 = vsel %vm706_vm6, %v705_v11, %v703_v12  ;;  %v707_v26 = vsel %vm706_vm6, %v703_v12, %v705_v11 }
  0x9e   : > { %v581_v5 = vsel %vm379_vm3, %v573_v63, 0  ;;  %v721_v20 = vmul.f32 %v2208_v13, %v708_v14  ;;  %v720_v30 = vmul.f32 %v2218_v24, %v707_v26 }
  0xa0   : > { %v723_v25 = vpack.c.bf16 %v721_v20, %v721_v20  ;;  %v781_v28 = vpop.permute.xlu1 %780  ;;  %v779_v29 = vpop.permute.xlu0 %778  ;;  %v722_v33 = vpack.c.bf16 %v720_v30, %v720_v30  ;;  %v1726_v20 = vld [vmem:[%s2511_s1 + $0x10] sm:$0x3] }
  0xa1   : > { %v784_v32 = vsel %vm782_vm7, %v781_v28, %v779_v29  ;;  %v783_v39 = vsel %vm782_vm7, %v779_v29, %v781_v28 }
  0xa2   : > { %v797_v34 = vmul.f32 %v2231_v31, %v784_v32  ;;  %v730_v36 = vsel %vm379_vm3, %v722_v33, 0  ;;  %v796_v44 = vmul.f32 %v2241_v37, %v783_v39 }
  0xa4   : > { %v799_v38 = vpack.c.bf16 %v797_v34, %v797_v34  ;;  %v857_v42 = vpop.permute.xlu1 %856  ;;  %v855_v43 = vpop.permute.xlu0 %854  ;;  %v798_v47 = vpack.c.bf16 %v796_v44, %v796_v44 }
  0xa5   : > { %v860_v46 = vsel %vm858_vm8, %v857_v42, %v855_v43 }
  0xa6   : > { %1707 = vmatmul.mubr.msk.bf16.vlgmr.msra.gmra.mrb[0].mxu0 %vm375_vm4, %v350_v55  ;;  %v873_v49 = vmul.f32 %v2254_v45, %v860_v46  ;;  %v806_v51 = vsel %vm379_vm3, %v798_v47, 0 }
  0xa7   : > { %511 = vmatpush1.bf16.msra.mxu0 %v505_v56  ;;  %542 = vmatprep.mubr.bf16.mxu0 %v1941_v1  ;;  %v859_v56 = vsel %vm858_vm8, %v855_v43, %v857_v42 }
  0xa8   : > { %1712 = vmatprep.subr.msk.bf16.mxu0 %vm379_vm3, %v574_v58  ;;  %v875_v55 = vpack.c.bf16 %v873_v49, %v873_v49  ;;  %v1702_v58 = vld [vmem:[%s2513_s3 + $0x10] sm:$0x3]  ;;  %v933_v59 = vpop.permute.xlu1 %932  ;;  %v931_v60 = vpop.permute.xlu0 %930  ;;  %v872_v61 = vmul.f32 %v2264_v52, %v859_v56 }
  0xa9   : > { %v2277_v62 = vrot.slane %v1702_v58, %v2101_v9  ;;  %v936_v63 = vsel %vm934_vm9, %v933_v59, %v931_v60  ;;  %v2287_v10 = vrot.slane %v1702_v58, %v2099_v8  ;;  %v935_v9 = vsel %vm934_vm9, %v931_v60, %v933_v59  ;;  %v1729_v60 = vld [vmem:[%s2512_s2 + $0x2] sm:$0x3] }
  0xaa   : > { %v874_v3 = vpack.c.bf16 %v872_v61, %v872_v61 }
  0xab   : > { %v948_v12 = vmul.f32 %v2287_v10, %v935_v9 }
  0xad   : > { %v950_v14 = vpack.c.bf16 %v948_v12, %v948_v12 }
  0xaf   : > { %v958_v8 = vsel %vm379_vm3, %v950_v14, 0 }
  0xb2   : > { %1710 = vmatmul.mubr.msk.bf16.vlgmr.msra.gmra.mrb[0].mxu0 %vm375_vm4, %v1708_v4  ;;  %v949_v4 = vmul.f32 %v2277_v62, %v936_v63 }
  0xb3   : > { %587 = vmatpush1.bf16.msra.mxu0 %v581_v5  ;;  %618 = vmatprep.mubr.bf16.mxu0 %v1941_v1  ;;  %v1720_v5 = vld [vmem:[%s2511_s1 + $0xc] sm:$0x3] }
  0xb4   : > { %1715 = vmatprep.subr.msk.bf16.mxu0 %vm379_vm3, %v647_v6  ;;  %v882_v6 = vsel %vm379_vm3, %v874_v3, 0  ;;  %v951_v11 = vpack.c.bf16 %v949_v4, %v949_v4 }
  0xbe   : > { %1713 = vmatmul.mubr.msk.bf16.vlgmr.msra.gmra.mrb[0].mxu0 %vm375_vm4, %v1711_v22  ;;  %v1010_v22 = vpop.permute.xlu0 %1009 }
  0xbf   : > { %660 = vmatpush1.bf16.msra.mxu0 %v654_v23  ;;  %691 = vmatprep.mubr.bf16.mxu0 %v1941_v1 }
  0xc0   : > { %1718 = vmatprep.subr.msk.bf16.mxu0 %vm379_vm3, %v723_v25  ;;  %v1018_v25 = vpop.permute.xlu1 %1017 }
  0xca   : > { %1716 = vmatmul.mubr.msk.bf16.vlgmr.msra.gmra.mrb[0].mxu0 %vm375_vm4, %v1714_v35 }
  0xcb   : > { %736 = vmatpush1.bf16.msra.mxu0 %v730_v36  ;;  %767 = vmatprep.mubr.bf16.mxu0 %v1941_v1  ;;  %v1589_v36 = vld [vmem:[%s2516_s6] sm:$0xf] }
  0xcc   : > { %1721 = vmatprep.subr.msk.bf16.mxu0 %vm379_vm3, %v799_v38  ;;  %v1597_v38 = vld [vmem:[%s2517_s7] sm:$0xf] }
  0xd6   : > { %1719 = vmatmul.mubr.msk.bf16.vlgmr.msra.gmra.mrb[0].mxu0 %vm375_vm4, %v1717_v50 }
  0xd7   : > { %812 = vmatpush1.bf16.msra.mxu0 %v806_v51  ;;  %843 = vmatprep.mubr.bf16.mxu0 %v1941_v1 }
  0xd8   : > { %1724 = vmatprep.subr.msk.bf16.mxu0 %vm379_vm3, %v875_v55 }
  0xe2   : > { %1722 = vmatmul.mubr.msk.bf16.vlgmr.msra.gmra.mrb[0].mxu0 %vm375_vm4, %v1720_v5 }
  0xe3   : > { %888 = vmatpush1.bf16.msra.mxu0 %v882_v6  ;;  %919 = vmatprep.mubr.bf16.mxu0 %v1941_v1 }
  0xe4   : > { %1727 = vmatprep.subr.msk.bf16.mxu0 %vm379_vm3, %v951_v11 }
  0xee   : > { %1725 = vmatmul.mubr.msk.bf16.vlgmr.msra.gmra.mrb[0].mxu0 %vm375_vm4, %v1723_v19 }
  0xef   : > { %964 = vmatpush1.bf16.msra.mxu0 %v958_v8  ;;  %995 = vmatprep.mubr.bf16.mxu0 %v1941_v1  ;;  %v1034_v8 = vld [vmem:[%s2512_s2] sm:$0x3] }
  0xfa   : > { %1728 = vmatmul.mubr.msk.bf16.vlgmr.msra.gmra.mrb[0].mxu0 %vm375_vm4, %v1726_v20 }
 0x1cd   : > { %v997_v23 = vpop.f32.mrb[0].mxu0 }
 0x1ce   : > { %v1012_v26 = vmul.f32 %v1010_v22, %v997_v23  ;;  %v999_v27 = vpop.f32.mrb[1].mxu0 }
 0x1cf   : > { %v1013_v28 = vmul.f32 %v1010_v22, %v999_v27  ;;  %v1001_v29 = vpop.f32.mrb[2].mxu0 }
 0x1d0   : > { %v1020_v30 = vadd.f32 %v1018_v25, %v1012_v26  ;;  %v1002_v32 = vpop.f32.mrb[3].mxu0  ;;  %v1734_v26 = vld [vmem:[%s2512_s2 + $0x4] sm:$0x3] }
 0x1d1   : > { %v1021_v33 = vadd.f32 %v1018_v25, %v1013_v28 }
 0x1d2   : > { %v2305_v34 = vmax.f32 %v1020_v30, 0.0 }
 0x1d3   : > { %v2307_v35 = vmax.f32 %v1021_v33, 0.0 }
 0x1d4   : > { %1035 = vrot.lane.b32.xlu1 %v2305_v34, %s1943_s23 }
 0x1d5   : > { %1037 = vrot.lane.b32.xlu0 %v2307_v35, %s1943_s23  ;;  %v1276_v25 = vmul.f32 %v2307_v35, %v2178_v54 }
 0x1d7   : > { %v1278_v28 = vpack.c.bf16 %v1276_v25, %v1276_v25 }
 0x1d8   : > { %1024 = vrot.lane.b32.xlu1 %v2305_v34, %s1942_s22 }
 0x1d9   : > { %1026 = vrot.lane.b32.xlu0 %v2307_v35, %s1942_s22  ;;  %s2523_s22 = smov 111  }
 0x1dc   : > { %1147 = vrot.lane.b32.xlu1 %v2305_v34, %s1944_s24 }
 0x1dd   : > { %1149 = vrot.lane.b32.xlu0 %v2307_v35, %s1944_s24 }
 0x1e0   : > { %1211 = vrot.lane.b32.xlu1 %v2305_v34, %s1945_s25 }
 0x1e1   : > { %1213 = vrot.lane.b32.xlu0 %v2307_v35, %s1945_s25 }
 0x1e4   : > { %1333 = vrot.lane.b32.xlu1 %v2305_v34, %s1946_s26 }
 0x1e5   : > { %1335 = vrot.lane.b32.xlu0 %v2307_v35, %s1946_s26  ;;  %s2468_s26 = scalar_lea.hbm %s2518_s8, %s1761_s20 }
 0x1e8   : > { %1397 = vrot.lane.b32.xlu1 %v2305_v34, %s1947_s10 }
 0x1e9   : > { %1399 = vrot.lane.b32.xlu0 %v2307_v35, %s1947_s10  ;;  %s1615_s10 = scalar_lea.sflag [#allocation3], %s296_s18 }
 0x1ec   : > { %1461 = vrot.lane.b32.xlu1 %v2305_v34, %s1948_s12 }
 0x1ed   : > { %1463 = vrot.lane.b32.xlu0 %v2307_v35, %s1948_s12 }
 0x1f0   : > { %1525 = vrot.lane.b32.xlu1 %v2305_v34, %s2523_s22 }
 0x1f1   : > { %1527 = vrot.lane.b32.xlu0 %v2307_v35, %s2523_s22  ;;  %v1737_v35 = vld [vmem:[%s2512_s2 + $0x6] sm:$0x3]  ;;  %s298_s22 = scalar_lea.vmem [#allocation2], %s1692_s19 }
 0x1f2   : > { %s1629_s23 = sshll.u32 %s298_s22, 4  ;;  %s2470_s23 = int_to_ptr.vmem [resolvable:$true] %s1629_s23 }
 0x1f3   : > { %s1877_s12 = scalar_lea.vmem %s2470_s23, 128  ;;  %p1884_p0 = scmp.lt.s32.totalorder %s2470_s23, %s1882_s13 }
 0x1f4   : > { %1592 = vperm.xlu1 %1875, %v1589_v36   ;;  %p1878_p11 = scmp.ne.s32.totalorder %s2470_s23, %s1877_s12  ;;  %p1885_p1 = scmp.lt.s32.totalorder %s1883_s21, %s1877_s12 }
 0x1f5   : > { %1600 = vperm.xlu0 %1874, %v1597_v38  }
 0x1f6   : > { %p1879_p12 = pnand %p1878_p11, %p2034_p5  ;;  %p1886_p2 = por %p1885_p1, %p1884_p0 }
 0x1f8   : > { %p1880_p13 = pneg %p1879_p12 }
 0x1fa   : > { %p1887_p3 = pnand %p1886_p2, %p1880_p13 }
 0x246   : > { %v1036_v39 = vpop.permute.xlu1 %1035 }
 0x247   : > { %v1038_v40 = vpop.permute.xlu0 %1037 }
 0x248   : > { %v1039_v42 = vsel %vm355_vm1, %v1036_v39, %v1038_v40  ;;  %v1040_v43 = vsel %vm355_vm1, %v1038_v40, %v1036_v39 }
 0x249   : > { %v1041_v44 = vmul.f32 %v1040_v43, %v2121_v17  ;;  %v1042_v46 = vmul.f32 %v1039_v42, %v2124_v18 }
 0x24a   : > { %v1025_v47 = vpop.permute.xlu1 %1024 }
 0x24b   : > { %v1027_v49 = vpop.permute.xlu0 %1026  ;;  %v1044_v50 = vpack.c.bf16 %v1042_v46, %v1042_v46  ;;  %v1043_v51 = vpack.c.bf16 %v1041_v44, %v1041_v44  ;;  %v1740_v44 = vld [vmem:[%s2512_s2 + $0x8] sm:$0x3] }
 0x24c   : > { %v1028_v55 = vsel %vm332_vm0, %v1025_v47, %v1027_v49  ;;  %v1029_v56 = vsel %vm332_vm0, %v1027_v49, %v1025_v47 }
 0x24d   : > { %v1030_v58 = vmul.f32 %v1029_v56, %v2115_v15  ;;  %v1031_v59 = vmul.f32 %v1028_v55, %v2118_v16  ;;  %1730 = vmatprep.subr.msk.bf16.mxu1 %vm379_vm3, %v1044_v50  ;;  %v1051_v17 = vsel %vm379_vm3, %v1043_v51, 0 }
 0x24e   : > { %1057 = vmatpush1.bf16.msra.mxu1 %v1051_v17  ;;  %v1148_v18 = vpop.permute.xlu1 %1147 }
 0x24f   : > { %v1032_v61 = vpack.c.bf16 %v1030_v58, %v1030_v58  ;;  %v1033_v63 = vpack.c.bf16 %v1031_v59, %v1031_v59  ;;  %v1150_v3 = vpop.permute.xlu0 %1149  ;;  %v1743_v58 = vld [vmem:[%s2512_s2 + $0xa] sm:$0x3] }
 0x250   : > { %v1151_v4 = vsel %vm481_vm2, %v1148_v18, %v1150_v3  ;;  %v1152_v5 = vsel %vm481_vm2, %v1150_v3, %v1148_v18 }
 0x251   : > { %v1154_v15 = vmul.f32 %v1151_v4, %v2128_v21  ;;  %1731 = vmatmul.mubr.msk.bf16.vlgmr.msra.gmra.mrb[0].mxu1 %vm375_vm4, %v1729_v60  ;;  %1732 = vmatprep.subr.msk.bf16.mxu1 %vm379_vm3, %v1033_v63  ;;  %v1101_v16 = vsel %vm379_vm3, %v1032_v61, 0  ;;  %v1153_v12 = vmul.f32 %v1152_v5, %v2153_v41  ;;  %v1746_v4 = vld [vmem:[%s2512_s2 + $0xc] sm:$0x3] }
 0x252   : > { %1107 = vmatpush1.bf16.msra.mxu1 %v1101_v16  ;;  %1138 = vmatprep.mubr.bf16.mxu1 %v1941_v1  ;;  %v1212_v11 = vpop.permute.xlu1 %1211 }
 0x253   : > { %v1156_v6 = vpack.c.bf16 %v1154_v15, %v1154_v15  ;;  %v1214_v9 = vpop.permute.xlu0 %1213  ;;  %v1155_v14 = vpack.c.bf16 %v1153_v12, %v1153_v12 }
 0x254   : > { %v1215_v21 = vsel %vm557_vm5, %v1212_v11, %v1214_v9  ;;  %v1216_v41 = vsel %vm557_vm5, %v1214_v9, %v1212_v11 }
 0x255   : > { %1735 = vmatprep.subr.msk.bf16.mxu1 %vm379_vm3, %v1156_v6  ;;  %v1218_v19 = vmul.f32 %v1215_v21, %v2166_v48  ;;  %v1163_v22 = vsel %vm379_vm3, %v1155_v14, 0  ;;  %v1217_v23 = vmul.f32 %v1216_v41, %v2185_v57  ;;  %v1275_v57 = vmul.f32 %v2305_v34, %v2175_v53  ;;  %v1749_v6 = vld [vmem:[%s2512_s2 + $0xe] sm:$0x3] }
 0x256   : > { %v1334_v29 = vpop.permute.xlu1 %1333 }
 0x257   : > { %v1220_v20 = vpack.c.bf16 %v1218_v19, %v1218_v19  ;;  %v1219_v48 = vpack.c.bf16 %v1217_v23, %v1217_v23  ;;  %v1336_v30 = vpop.permute.xlu0 %1335  ;;  %v1277_v33 = vpack.c.bf16 %v1275_v57, %v1275_v57 }
 0x258   : > { %v1338_v54 = vsel %vm706_vm6, %v1336_v30, %v1334_v29  ;;  %v1337_v39 = vsel %vm706_vm6, %v1334_v29, %v1336_v30 }
 0x259   : > { %v1227_v27 = vsel %vm379_vm3, %v1219_v48, 0  ;;  %v1340_v32 = vmul.f32 %v1338_v54, %v2208_v13  ;;  %v1285_v38 = vsel %vm379_vm3, %v1277_v33, 0  ;;  %v1339_v13 = vmul.f32 %v1337_v39, %v2218_v24 }
 0x25a   : > { %v1398_v53 = vpop.permute.xlu1 %1397 }
 0x25b   : > { %v1342_v36 = vpack.c.bf16 %v1340_v32, %v1340_v32  ;;  %v1400_v34 = vpop.permute.xlu0 %1399  ;;  %v1341_v42 = vpack.c.bf16 %v1339_v13, %v1339_v13 }
 0x25c   : > { %v1402_v40 = vsel %vm782_vm7, %v1400_v34, %v1398_v53  ;;  %v1401_v49 = vsel %vm782_vm7, %v1398_v53, %v1400_v34 }
 0x25d   : > { %1733 = vmatmul.mubr.msk.bf16.vlgmr.msra.gmra.mrb[0].mxu1 %vm375_vm4, %v1034_v8  ;;  %v1404_v43 = vmul.f32 %v1402_v40, %v2231_v31  ;;  %v1349_v47 = vsel %vm379_vm3, %v1341_v42, 0  ;;  %v1403_v31 = vmul.f32 %v1401_v49, %v2241_v37 }
 0x25e   : > { %1169 = vmatpush1.bf16.msra.mxu1 %v1163_v22  ;;  %1200 = vmatprep.mubr.bf16.mxu1 %v1941_v1  ;;  %v1462_v24 = vpop.permute.xlu1 %1461 }
 0x25f   : > { %1738 = vmatprep.subr.msk.bf16.mxu1 %vm379_vm3, %v1220_v20  ;;  %v1406_v46 = vpack.c.bf16 %v1404_v43, %v1404_v43  ;;  %v1464_v50 = vpop.permute.xlu0 %1463  ;;  %v1405_v55 = vpack.c.bf16 %v1403_v31, %v1403_v31 }
 0x260   : > { %v1466_v51 = vsel %vm858_vm8, %v1464_v50, %v1462_v24  ;;  %v1465_v18 = vsel %vm858_vm8, %v1462_v24, %v1464_v50 }
 0x261   : > { %v1468_v56 = vmul.f32 %v1466_v51, %v2254_v45  ;;  %v1413_v17 = vsel %vm379_vm3, %v1405_v55, 0  ;;  %v1467_v45 = vmul.f32 %v1465_v18, %v2264_v52 }
 0x262   : > { %v1526_v37 = vpop.permute.xlu1 %1525 }
 0x263   : > { %v1470_v59 = vpack.c.bf16 %v1468_v56, %v1468_v56  ;;  %v1528_v60 = vpop.permute.xlu0 %1527  ;;  %v1469_v63 = vpack.c.bf16 %v1467_v45, %v1467_v45 }
 0x264   : > { %v1530_v61 = vsel %vm934_vm9, %v1528_v60, %v1526_v37  ;;  %v1529_v5 = vsel %vm934_vm9, %v1526_v37, %v1528_v60 }
 0x265   : > { %v1532_v3 = vmul.f32 %v1530_v61, %v2277_v62  ;;  %v1477_v16 = vsel %vm379_vm3, %v1469_v63, 0  ;;  %v1531_v52 = vmul.f32 %v1529_v5, %v2287_v10 }
 0x267   : > { %v1534_v15 = vpack.c.bf16 %v1532_v3, %v1532_v3  ;;  %v1533_v62 = vpack.c.bf16 %v1531_v52, %v1531_v52 }
 0x269   : > { %1736 = vmatmul.mubr.msk.bf16.vlgmr.msra.gmra.mrb[0].mxu1 %vm375_vm4, %v1734_v26  ;;  %v1541_v11 = vsel %vm379_vm3, %v1533_v62, 0 }
 0x26a   : > { %1233 = vmatpush1.bf16.msra.mxu1 %v1227_v27  ;;  %1264 = vmatprep.mubr.bf16.mxu1 %v1941_v1 }
 0x26b   : > { %1741 = vmatprep.subr.msk.bf16.mxu1 %vm379_vm3, %v1278_v28 }
 0x273   : > { %v1593_v10 = vpop.permute.xlu1 %1592 }
 0x274   : > { %v1601_v14 = vpop.permute.xlu0 %1600 }
 0x275   : > { %1739 = vmatmul.mubr.msk.bf16.vlgmr.msra.gmra.mrb[0].mxu1 %vm375_vm4, %v1737_v35 }
 0x276   : > { %1291 = vmatpush1.bf16.msra.mxu1 %v1285_v38  ;;  %1322 = vmatprep.mubr.bf16.mxu1 %v1941_v1 }
 0x277   : > { %1744 = vmatprep.subr.msk.bf16.mxu1 %vm379_vm3, %v1342_v36 }
 0x281   : > { %1742 = vmatmul.mubr.msk.bf16.vlgmr.msra.gmra.mrb[0].mxu1 %vm375_vm4, %v1740_v44 }
 0x282   : > { %1355 = vmatpush1.bf16.msra.mxu1 %v1349_v47  ;;  %1386 = vmatprep.mubr.bf16.mxu1 %v1941_v1 }
 0x283   : > { %1747 = vmatprep.subr.msk.bf16.mxu1 %vm379_vm3, %v1406_v46 }
 0x28d   : > { %1745 = vmatmul.mubr.msk.bf16.vlgmr.msra.gmra.mrb[0].mxu1 %vm375_vm4, %v1743_v58 }
 0x28e   : > { %1419 = vmatpush1.bf16.msra.mxu1 %v1413_v17  ;;  %1450 = vmatprep.mubr.bf16.mxu1 %v1941_v1 }
 0x28f   : > { %1750 = vmatprep.subr.msk.bf16.mxu1 %vm379_vm3, %v1470_v59 }
 0x299   : > { %1748 = vmatmul.mubr.msk.bf16.vlgmr.msra.gmra.mrb[0].mxu1 %vm375_vm4, %v1746_v4 }
 0x29a   : > { %1483 = vmatpush1.bf16.msra.mxu1 %v1477_v16  ;;  %1514 = vmatprep.mubr.bf16.mxu1 %v1941_v1 }
 0x29b   : > { %1753 = vmatprep.subr.msk.bf16.mxu1 %vm379_vm3, %v1534_v15 }
 0x2a5   : > { %1751 = vmatmul.mubr.msk.bf16.vlgmr.msra.gmra.mrb[0].mxu1 %vm375_vm4, %v1749_v6 }
 0x2a6   : > { %1547 = vmatpush1.bf16.msra.mxu1 %v1541_v11  ;;  %1578 = vmatprep.mubr.bf16.mxu1 %v1941_v1 }
 0x2b1   : > { %1754 = vmatmul.mubr.msk.bf16.vlgmr.msra.gmra.mrb[0].mxu1 %vm375_vm4, %v1752_v7 }
 0x384   : > { %v1580_v9 = vpop.f32.mrb[0].mxu1 }
 0x385   : > { %v1595_v12 = vmul.f32 %v1593_v10, %v1580_v9  ;;  %v1582_v21 = vpop.f32.mrb[1].mxu1 }
 0x386   : > { %v1596_v19 = vmul.f32 %v1593_v10, %v1582_v21  ;;  %v1584_v8 = vpop.f32.mrb[2].mxu1 }
 0x387   : > { %v1603_v20 = vadd.f32 %v1601_v14, %v1595_v12  ;;  %v1585_v22 = vpop.f32.mrb[3].mxu1 }
 0x388   : > { %v1604_v1 = vadd.f32 %v1601_v14, %v1596_v19 }
 0x389   : > { %v1605_v41 = vadd.f32 %v1603_v20, %v2049_v0 }
 0x38a   : > { %v1606_v23 = vadd.f32 %v1604_v1, %v2058_v2 }
 0x38b   : > { %v1607_v48 = vmax.f32 %v1605_v41, 0.0 }
 0x38c   : > { %v1608_v25 = vmax.f32 %v1606_v23, 0.0 }
 0x38e   : > { %v1611_v26 = vcombine.low %v1607_v48, %v1608_v25 }
 0x390   : > { %1613 = vst [vmem:[%s298_s22] sm:$0xff] %v1611_v26 }
 0x391   : > { %1890 = shalt.err (!%p1887_p3)
}
 0x392   : > { %s1891_s17 = scalar_lea.hbm %s2468_s26, 128  ;;  %s1895_s20 = scalar_lea.hbm %s2518_s8, 256 }
 0x393   : > { %p1892_p4 = scmp.ne.s32.totalorder %s2468_s26, %s1891_s17  ;;  %p1896_p9 = scmp.lt.u32.totalorder %s2468_s26, %s2518_s8 }
 0x394   : > { %p1897_p10 = scmp.lt.u32.totalorder %s1895_s20, %s1891_s17  ;;  %p1899_p12 = scmp.lt.u32.totalorder %s1891_s17, %s2468_s26 }
 0x395   : > { %p1893_p7 = pnand %p1892_p4, %p2034_p5 }
 0x396   : > { %p1898_p11 = por %p1897_p10, %p1896_p9 }
 0x397   : > { %p1894_p8 = pneg %p1893_p7 }
 0x398   : > { %p1900_p13 = por %p1899_p12, %p1898_p11 }
 0x39a   : > { %p1901_p0 = pnand %p1900_p13, %p1894_p8 }
 0x39c   : > { %1904 = shalt.err (!%p1901_p0)
}
 0x39d   : > { %1826 = dma.vmem_to_hbm [thread:$0]  (%p2034_p5), %s2470_s23, 128, %s2468_s26, %s1615_s10  }
 0x39e PF: > { %p1832_p1 = scmp.ge.s32.totalorder %s1939_s30, 2  ;;  %s1641_s25 = sand.u32 1, %s1927_s27  }
 0x39f   : > { %s1642_s12 = scalar_lea.sflag [#allocation3], %s1641_s25 }
 0x3a0   : > { %p1829_p2 = pnand %p1832_p1, %p2038_p6 }
 0x3a2   : > { %1922 = dma.done.wait (!%p1829_p2), %s1642_s12, 128  }
 0x3a3   : > { %1924 = vsyncadd (!%p1829_p2), %s1642_s12, 4294967168  ;;  %p18_p3 = scmp.ge.s32.totalorder %s2021_s11, 4   ;;  %s2524_s27 = smov %s1931_s28 }
 0x3a4   : > { %s2525_s28 = smov %s1935_s29  ;;  %s2526_s29 = smov %s2032_s14 }
 0x3a5   : > { %s2527_s30 = smov %s2021_s11  ;;  %20 = sbr.rel (!%p18_p3) target bundleno = 3 (0x3), region = 111 }
 0x3ac   :  { %1647 = vsyncpa [#allocation3], 1 }
 0x3ad   :  { %1649 = vsyncpa [#allocation3 + $0x1], 1 }

</bundles_post_ra>
